<compile_context>
chip_gen: v5e
topology: v5e:2x2
jax: 0.10.0
libtpu: 0.0.40
codegen_flags: <defaults>
</compile_context>

<pallas_src>
import functools

import jax
import jax.numpy as jnp
from jax import lax
from jax.experimental import pallas as pl
from jax.experimental.pallas import tpu as pltpu


# ----------------------------------------------------------------------------
# Tiling helpers
# ----------------------------------------------------------------------------
def _row_tile(m):
    """Row tile for the (T*B, D) input-projection matmul."""
    for tm in (512, 256, 128):
        if m % tm == 0:
            return tm
    return m  # full extent (always legal)


def _batch_tile(b):
    """Batch tile for the recurrence kernels (multiple of 8 or full)."""
    for tb in (64, 32, 16, 8):
        if b % tb == 0:
            return tb
    return b  # full extent (always legal)


# ----------------------------------------------------------------------------
# Pallas kernels
# ----------------------------------------------------------------------------
def _in_proj_kernel(x_ref, wf_ref, bf_ref, wb_ref, bb_ref, gxf_ref, gxb_ref):
    """Hoisted input projection for BOTH directions: one big MXU matmul each.

    x_ref:  (TM, D)  bf16     wf/wb_ref: (D, 4H) bf16     bf/bb_ref: (1, 4H) f32
    gxf_ref/gxb_ref: (TM, 4H) f32   (= x @ W_ih^T + (b_ih + b_hh))
    """
    x = x_ref[...]
    gxf_ref[...] = (jnp.dot(x, wf_ref[...], preferred_element_type=jnp.float32)
                    + bf_ref[...])
    gxb_ref[...] = (jnp.dot(x, wb_ref[...], preferred_element_type=jnp.float32)
                    + bb_ref[...])


def _lstm_cell(gates, c, H):
    """f32 gate math (i, f, g, o ordering, like torch.nn.LSTM)."""
    i_g = jax.nn.sigmoid(gates[:, 0 * H:1 * H])
    f_g = jax.nn.sigmoid(gates[:, 1 * H:2 * H])
    g_g = jnp.tanh(gates[:, 2 * H:3 * H])
    o_g = jax.nn.sigmoid(gates[:, 3 * H:4 * H])
    c_new = f_g * c + i_g * g_g
    h_new = o_g * jnp.tanh(c_new)
    return h_new, c_new


def _bilstm_seq_kernel(T, H, gxf_ref, gxb_ref, seqlen_ref, whhf_ref, whhb_ref,
                       out_ref, h_f, c_f, h_b, c_b):
    """Fused fwd+bwd recurrence for an intermediate layer.

    gx*_ref:  (T, TB, 4H) f32 (precomputed x @ W_ih + b)
    seqlen:   (TB, 1) int32
    whh*_ref: (H, 4H) bf16
    out_ref:  (T, TB, 2H) bf16    (fwd -> [..., :H], bwd -> [..., H:])
    """
    h_f[...] = jnp.zeros_like(h_f)
    c_f[...] = jnp.zeros_like(c_f)
    h_b[...] = jnp.zeros_like(h_b)
    c_b[...] = jnp.zeros_like(c_b)

    # Invariants hoisted out of the time loop.
    whh_f = whhf_ref[...]
    whh_b = whhb_ref[...]
    seqlen = seqlen_ref[...]

    def step(t, carry):
        # ---- forward direction at time t ----
        gf = gxf_ref[t] + jnp.dot(h_f[...].astype(jnp.bfloat16), whh_f,
                                  preferred_element_type=jnp.float32)
        hf_new, cf_new = _lstm_cell(gf, c_f[...], H)
        valid_f = t < seqlen
        h_f[...] = jnp.where(valid_f, hf_new, h_f[...])
        c_f[...] = jnp.where(valid_f, cf_new, c_f[...])
        out_ref[t, :, 0:H] = jnp.where(valid_f, hf_new, 0.0).astype(out_ref.dtype)

        # ---- backward direction at time T-1-t ----
        tt = T - 1 - t
        gb = gxb_ref[tt] + jnp.dot(h_b[...].astype(jnp.bfloat16), whh_b,
                                   preferred_element_type=jnp.float32)
        hb_new, cb_new = _lstm_cell(gb, c_b[...], H)
        valid_b = tt < seqlen
        h_b[...] = jnp.where(valid_b, hb_new, h_b[...])
        c_b[...] = jnp.where(valid_b, cb_new, c_b[...])
        out_ref[tt, :, H:2 * H] = jnp.where(valid_b, hb_new,
                                            0.0).astype(out_ref.dtype)
        return carry

    lax.fori_loop(0, T, step, 0, unroll=2)


def _bilstm_pool_fc_kernel(T, H, gxf_ref, gxb_ref, seqlen_ref, whhf_ref,
                           whhb_ref, fcw_ref, fcb_ref, out_ref,
                           h_f, c_f, h_b, c_b, mx_scr):
    """Last layer: fused fwd+bwd recurrence + running max over time + FC.

    fcw_ref: (2H, C) bf16, fcb_ref: (1, C) f32, out_ref: (TB, C) f32,
    mx_scr:  (TB, 2H) f32 running max (includes the 0 rows of padded timesteps,
    matching pad_packed_sequence(padding_value=0) + torch.max).
    """
    h_f[...] = jnp.zeros_like(h_f)
    c_f[...] = jnp.zeros_like(c_f)
    h_b[...] = jnp.zeros_like(h_b)
    c_b[...] = jnp.zeros_like(c_b)
    mx_scr[...] = jnp.full_like(mx_scr, -jnp.inf)

    whh_f = whhf_ref[...]
    whh_b = whhb_ref[...]
    seqlen = seqlen_ref[...]

    def step(t, carry):
        gf = gxf_ref[t] + jnp.dot(h_f[...].astype(jnp.bfloat16), whh_f,
                                  preferred_element_type=jnp.float32)
        hf_new, cf_new = _lstm_cell(gf, c_f[...], H)
        valid_f = t < seqlen
        h_f[...] = jnp.where(valid_f, hf_new, h_f[...])
        c_f[...] = jnp.where(valid_f, cf_new, c_f[...])
        mx_scr[:, 0:H] = jnp.maximum(mx_scr[:, 0:H],
                                     jnp.where(valid_f, hf_new, 0.0))

        tt = T - 1 - t
        gb = gxb_ref[tt] + jnp.dot(h_b[...].astype(jnp.bfloat16), whh_b,
                                   preferred_element_type=jnp.float32)
        hb_new, cb_new = _lstm_cell(gb, c_b[...], H)
        valid_b = tt < seqlen
        h_b[...] = jnp.where(valid_b, hb_new, h_b[...])
        c_b[...] = jnp.where(valid_b, cb_new, c_b[...])
        mx_scr[:, H:2 * H] = jnp.maximum(mx_scr[:, H:2 * H],
                                         jnp.where(valid_b, hb_new, 0.0))
        return carry

    lax.fori_loop(0, T, step, 0, unroll=2)

    pooled = mx_scr[...].astype(jnp.bfloat16)                      # (TB, 2H)
    out_ref[...] = (jnp.dot(pooled, fcw_ref[...],
                            preferred_element_type=jnp.float32)
                    + fcb_ref[...])


# ----------------------------------------------------------------------------
# pallas_call wrappers
# ----------------------------------------------------------------------------
def in_proj(x_flat, w_ih_f, b_f, w_ih_b, b_b):
    """x_flat: (T*B, D) bf16 -> (gx_fwd, gx_bwd) each (T*B, 4H) f32."""
    M, D = x_flat.shape
    G = w_ih_f.shape[1]
    TM = _row_tile(M)
    return pl.pallas_call(
        _in_proj_kernel,
        out_shape=(jax.ShapeDtypeStruct((M, G), jnp.float32),
                   jax.ShapeDtypeStruct((M, G), jnp.float32)),
        grid=(M // TM,),
        in_specs=[pl.BlockSpec((TM, D), lambda i: (i, 0)),
                  pl.BlockSpec((D, G), lambda i: (0, 0)),
                  pl.BlockSpec((1, G), lambda i: (0, 0)),
                  pl.BlockSpec((D, G), lambda i: (0, 0)),
                  pl.BlockSpec((1, G), lambda i: (0, 0))],
        out_specs=(pl.BlockSpec((TM, G), lambda i: (i, 0)),
                   pl.BlockSpec((TM, G), lambda i: (i, 0))),
        compiler_params=pltpu.CompilerParams(
            dimension_semantics=("parallel",)),
    )(x_flat, w_ih_f, b_f, w_ih_b, b_b)


def bilstm_layer(gxf, gxb, seqlen, whh_f, whh_b, H):
    """Intermediate layer recurrence -> (T, B, 2H) bf16."""
    T, B, G = gxf.shape
    TB = _batch_tile(B)
    kernel = functools.partial(_bilstm_seq_kernel, T, H)
    return pl.pallas_call(
        kernel,
        out_shape=jax.ShapeDtypeStruct((T, B, 2 * H), jnp.bfloat16),
        grid=(B // TB,),
        in_specs=[pl.BlockSpec((T, TB, G), lambda i: (0, i, 0)),
                  pl.BlockSpec((T, TB, G), lambda i: (0, i, 0)),
                  pl.BlockSpec((TB, 1), lambda i: (i, 0)),
                  pl.BlockSpec((H, G), lambda i: (0, 0)),
                  pl.BlockSpec((H, G), lambda i: (0, 0))],
        out_specs=pl.BlockSpec((T, TB, 2 * H), lambda i: (0, i, 0)),
        scratch_shapes=[pltpu.VMEM((TB, H), jnp.float32)] * 4,  # h_f, c_f, h_b, c_b
        compiler_params=pltpu.CompilerParams(
            dimension_semantics=("parallel",)),
    )(gxf, gxb, seqlen, whh_f, whh_b)


def bilstm_last_layer(gxf, gxb, seqlen, whh_f, whh_b, fc_w_t, fc_b, H):
    """Last layer recurrence fused with max-over-time + FC -> (B, C) f32."""
    T, B, G = gxf.shape
    C = fc_w_t.shape[1]
    TB = _batch_tile(B)
    kernel = functools.partial(_bilstm_pool_fc_kernel, T, H)
    return pl.pallas_call(
        kernel,
        out_shape=jax.ShapeDtypeStruct((B, C), jnp.float32),
        grid=(B // TB,),
        in_specs=[pl.BlockSpec((T, TB, G), lambda i: (0, i, 0)),
                  pl.BlockSpec((T, TB, G), lambda i: (0, i, 0)),
                  pl.BlockSpec((TB, 1), lambda i: (i, 0)),
                  pl.BlockSpec((H, G), lambda i: (0, 0)),
                  pl.BlockSpec((H, G), lambda i: (0, 0)),
                  pl.BlockSpec((2 * H, C), lambda i: (0, 0)),
                  pl.BlockSpec((1, C), lambda i: (0, 0))],
        out_specs=pl.BlockSpec((TB, C), lambda i: (i, 0)),
        scratch_shapes=[pltpu.VMEM((TB, H), jnp.float32)] * 4      # h_f, c_f, h_b, c_b
                       + [pltpu.VMEM((TB, 2 * H), jnp.float32)],   # running max
        compiler_params=pltpu.CompilerParams(
            dimension_semantics=("parallel",)),
    )(gxf, gxb, seqlen, whh_f, whh_b, fc_w_t, fc_b)


# ----------------------------------------------------------------------------
# Parameter init (deterministic, PyTorch-style shapes; bf16 MXU operands)
# ----------------------------------------------------------------------------
def init_params(key, vocab, embed_dim, hidden_size, num_layers, num_classes):
    assert hidden_size % 2 == 0
    H = hidden_size // 2
    keys = jax.random.split(key, 2 + num_layers)

    params = {"embed": jax.random.normal(keys[0], (vocab, embed_dim),
                                         dtype=jnp.float32)}

    lstm_layers = []
    bound = 1.0 / float(jnp.sqrt(H))
    for layer in range(num_layers):
        d_in = embed_dim if layer == 0 else hidden_size
        dir_keys = jax.random.split(keys[2 + layer], 8)
        dirs = []
        for d in range(2):  # 0 = forward, 1 = backward
            kk = dir_keys[4 * d:4 * d + 4]
            w_ih = jax.random.uniform(kk[0], (4 * H, d_in), jnp.float32,
                                      -bound, bound)
            w_hh = jax.random.uniform(kk[1], (4 * H, H), jnp.float32,
                                      -bound, bound)
            b_ih = jax.random.uniform(kk[2], (4 * H,), jnp.float32,
                                      -bound, bound)
            b_hh = jax.random.uniform(kk[3], (4 * H,), jnp.float32,
                                      -bound, bound)
            dirs.append({
                "w_ih_t": w_ih.T.astype(jnp.bfloat16),   # (d_in, 4H) bf16
                "w_hh_t": w_hh.T.astype(jnp.bfloat16),   # (H, 4H)    bf16
                "b": (b_ih + b_hh)[None, :],             # (1, 4H)    f32
            })
        lstm_layers.append(tuple(dirs))
    params["lstm"] = lstm_layers

    fc_bound = 1.0 / float(jnp.sqrt(hidden_size))
    fk = jax.random.split(keys[1], 2)
    fc_w = jax.random.uniform(fk[0], (num_classes, hidden_size), jnp.float32,
                              -fc_bound, fc_bound)
    fc_b = jax.random.uniform(fk[1], (num_classes,), jnp.float32,
                              -fc_bound, fc_bound)
    params["fc_w_t"] = fc_w.T.astype(jnp.bfloat16)       # (hidden_size, C) bf16
    params["fc_b"] = fc_b[None, :]                       # (1, C)           f32
    return params


# ----------------------------------------------------------------------------
# Forward pass (Pallas) and pure-JAX reference
# ----------------------------------------------------------------------------
def bilstm_maxpool_cls(params, chars, seq_len):
    # Embedding gather is plain XLA glue (data-dependent gather); LSTM/pool/FC
    # compute runs in the Pallas kernels above.
    emb = jnp.take(params["embed"], chars, axis=0)              # (B, T, E) f32
    x = jnp.transpose(emb, (1, 0, 2)).astype(jnp.bfloat16)      # (T, B, E) bf16
    seqlen = seq_len.astype(jnp.int32)[:, None]                 # (B, 1)
    T, B, _ = x.shape
    n_layers = len(params["lstm"])

    for li, (fwd, bwd) in enumerate(params["lstm"]):
        H = fwd["w_hh_t"].shape[0]
        # Hoisted input projection: one big MXU matmul over (T*B, D).
        x2 = x.reshape(T * B, x.shape[-1])                      # free row-major reshape
        gxf, gxb = in_proj(x2, fwd["w_ih_t"], fwd["b"], bwd["w_ih_t"], bwd["b"])
        gxf = gxf.reshape(T, B, 4 * H)
        gxb = gxb.reshape(T, B, 4 * H)
        # TODO(synk): for very long T on v7x, stream gxf/gxb in T-chunks
        # (pl.ANY + double-buffered DMA) instead of whole-sequence residency.

        if li == n_layers - 1:
            # Dropout(p=0.3) is identity in eval mode; pool + FC fused in-kernel.
            logits = bilstm_last_layer(gxf, gxb, seqlen,
                                       fwd["w_hh_t"], bwd["w_hh_t"],
                                       params["fc_w_t"], params["fc_b"], H)
            return {"pred": logits}

        x = bilstm_layer(gxf, gxb, seqlen, fwd["w_hh_t"], bwd["w_hh_t"], H)

    raise ValueError("num_layers must be >= 1")


def bilstm_maxpool_cls_ref(params, chars, seq_len):
    """Pure-JAX reference with the same bf16 MXU operand / f32 accumulation choices."""
    emb = jnp.take(params["embed"], chars, axis=0)
    x = jnp.transpose(emb, (1, 0, 2)).astype(jnp.bfloat16)
    seqlen = seq_len.astype(jnp.int32)[:, None]
    T, B, _ = x.shape
    n_layers = len(params["lstm"])

    def run_dir(gx, whh, reverse, H):
        h = jnp.zeros((B, H), jnp.float32)
        c = jnp.zeros((B, H), jnp.float32)
        outs = [None] * T
        order = range(T - 1, -1, -1) if reverse else range(T)
        for t in order:
            gates = gx[t] + jnp.dot(h.astype(jnp.bfloat16), whh,
                                    preferred_element_type=jnp.float32)
            i_g = jax.nn.sigmoid(gates[:, :H])
            f_g = jax.nn.sigmoid(gates[:, H:2 * H])
            g_g = jnp.tanh(gates[:, 2 * H:3 * H])
            o_g = jax.nn.sigmoid(gates[:, 3 * H:4 * H])
            c_new = f_g * c + i_g * g_g
            h_new = o_g * jnp.tanh(c_new)
            valid = t < seqlen
            h = jnp.where(valid, h_new, h)
            c = jnp.where(valid, c_new, c)
            outs[t] = jnp.where(valid, h_new, 0.0)
        return jnp.stack(outs, axis=0)                          # (T, B, H) f32

    for li, (fwd, bwd) in enumerate(params["lstm"]):
        H = fwd["w_hh_t"].shape[0]
        x2 = x.reshape(T * B, x.shape[-1])
        gxf = (jnp.dot(x2, fwd["w_ih_t"], preferred_element_type=jnp.float32)
               + fwd["b"]).reshape(T, B, 4 * H)
        gxb = (jnp.dot(x2, bwd["w_ih_t"], preferred_element_type=jnp.float32)
               + bwd["b"]).reshape(T, B, 4 * H)
        out_f = run_dir(gxf, fwd["w_hh_t"], False, H)
        out_b = run_dir(gxb, bwd["w_hh_t"], True, H)
        full = jnp.concatenate([out_f, out_b], axis=-1)         # (T, B, 2H) f32
        if li == n_layers - 1:
            pooled = jnp.max(full, axis=0)                      # includes 0 pad rows
            logits = (jnp.dot(pooled.astype(jnp.bfloat16), params["fc_w_t"],
                              preferred_element_type=jnp.float32)
                      + params["fc_b"])
            return {"pred": logits}
        x = full.astype(jnp.bfloat16)

    raise ValueError("num_layers must be >= 1")


# ----------------------------------------------------------------------------
if __name__ == "__main__":
    B, T = 2, 8
    vocab, embed_dim = 20, 16
    hidden_size, num_layers, num_classes = 32, 2, 5

    key = jax.random.PRNGKey(0)
    k_params, k_chars = jax.random.split(key)
    params = init_params(k_params, vocab, embed_dim, hidden_size,
                         num_layers, num_classes)

    chars = jax.random.randint(k_chars, (B, T), 0, vocab, dtype=jnp.int32)
    seq_len = jnp.array([T, 5], dtype=jnp.int32)

    out = bilstm_maxpool_cls(params, chars, seq_len)
    logits = jax.block_until_ready(out["pred"])

    ref = bilstm_maxpool_cls_ref(params, chars, seq_len)["pred"]
    assert logits.shape == (B, num_classes)
    assert jnp.allclose(logits, ref, rtol=1e-3, atol=1e-3), (logits, ref)

    print("KERNEL_OK")
</pallas_src>

<mosaic_0001>
module attributes {stable_mosaic.version = 11 : i64} {
  func.func @_in_proj_kernel(%arg0: i32, %arg1: memref<16x16xbf16, #tpu.memory_space<vmem>>, %arg2: memref<16x64xbf16, #tpu.memory_space<vmem>>, %arg3: memref<1x64xf32, #tpu.memory_space<vmem>>, %arg4: memref<16x64xbf16, #tpu.memory_space<vmem>>, %arg5: memref<1x64xf32, #tpu.memory_space<vmem>>, %arg6: memref<16x64xf32, #tpu.memory_space<vmem>>, %arg7: memref<16x64xf32, #tpu.memory_space<vmem>>) attributes {dimension_semantics = [#tpu.dimension_semantics<parallel>], iteration_bounds = array<i64: 1>, scalar_prefetch = 0 : i64, scratch_operands = 0 : i64, tpu.core_type = #tpu.core_type<tc>, window_params = [{transform_indices = @transform_0, window_bounds = array<i64: 16, 16>}, {pipeline_mode = #tpu.pipeline_mode<synchronous>, transform_indices = @transform_1, window_bounds = array<i64: 16, 64>}, {pipeline_mode = #tpu.pipeline_mode<synchronous>, transform_indices = @transform_2, window_bounds = array<i64: 1, 64>}, {pipeline_mode = #tpu.pipeline_mode<synchronous>, transform_indices = @transform_3, window_bounds = array<i64: 16, 64>}, {pipeline_mode = #tpu.pipeline_mode<synchronous>, transform_indices = @transform_4, window_bounds = array<i64: 1, 64>}, {transform_indices = @transform_5, window_bounds = array<i64: 16, 64>}, {transform_indices = @transform_6, window_bounds = array<i64: 16, 64>}]} {
    %c0 = arith.constant 0 : index
    %c0_0 = arith.constant 0 : index
    %0 = vector.load %arg1[%c0, %c0_0] : memref<16x16xbf16, #tpu.memory_space<vmem>>, vector<16x16xbf16>
    %c0_1 = arith.constant 0 : index
    %c0_2 = arith.constant 0 : index
    %1 = vector.load %arg2[%c0_1, %c0_2] : memref<16x64xbf16, #tpu.memory_space<vmem>>, vector<16x64xbf16>
    %cst = arith.constant dense<0.000000e+00> : vector<16x64xf32>
    %2 = tpu.matmul %0, %1, %cst {dimension_numbers = #tpu.dot_dimension_numbers<[1], [0], [0], [1], [0, 0, 1, 1], [], []>} : vector<16x16xbf16>, vector<16x64xbf16>, vector<16x64xf32> -> vector<16x64xf32>
    %c0_3 = arith.constant 0 : index
    %c0_4 = arith.constant 0 : index
    %3 = vector.load %arg3[%c0_3, %c0_4] : memref<1x64xf32, #tpu.memory_space<vmem>>, vector<1x64xf32>
    %4 = vector.broadcast %3 : vector<1x64xf32> to vector<16x64xf32>
    %5 = arith.addf %2, %4 : vector<16x64xf32>
    %c0_5 = arith.constant 0 : index
    %c0_6 = arith.constant 0 : index
    %6 = vector.load %arg6[%c0_5, %c0_6] : memref<16x64xf32, #tpu.memory_space<vmem>>, vector<16x64xf32>
    tpu.vector_store %arg6[%c0_5, %c0_6], %5 {strides = array<i32>} : memref<16x64xf32, #tpu.memory_space<vmem>>, vector<16x64xf32>,
    %c0_7 = arith.constant 0 : index
    %c0_8 = arith.constant 0 : index
    %7 = vector.load %arg4[%c0_7, %c0_8] : memref<16x64xbf16, #tpu.memory_space<vmem>>, vector<16x64xbf16>
    %cst_9 = arith.constant dense<0.000000e+00> : vector<16x64xf32>
    %8 = tpu.matmul %0, %7, %cst_9 {dimension_numbers = #tpu.dot_dimension_numbers<[1], [0], [0], [1], [0, 0, 1, 1], [], []>} : vector<16x16xbf16>, vector<16x64xbf16>, vector<16x64xf32> -> vector<16x64xf32>
    %c0_10 = arith.constant 0 : index
    %c0_11 = arith.constant 0 : index
    %9 = vector.load %arg5[%c0_10, %c0_11] : memref<1x64xf32, #tpu.memory_space<vmem>>, vector<1x64xf32>
    %10 = vector.broadcast %9 : vector<1x64xf32> to vector<16x64xf32>
    %11 = arith.addf %8, %10 : vector<16x64xf32>
    %c0_12 = arith.constant 0 : index
    %c0_13 = arith.constant 0 : index
    %12 = vector.load %arg7[%c0_12, %c0_13] : memref<16x64xf32, #tpu.memory_space<vmem>>, vector<16x64xf32>
    tpu.vector_store %arg7[%c0_12, %c0_13], %11 {strides = array<i32>} : memref<16x64xf32, #tpu.memory_space<vmem>>, vector<16x64xf32>,
    return
  }
  func.func @transform_0(%arg0: i32) -> (i32, i32) {
    %c0_i32 = arith.constant 0 : i32
    %c0_i32_0 = arith.constant 0 : i32
    return %arg0, %c0_i32 : i32, i32
  }
  func.func @transform_1(%arg0: i32) -> (i32, i32) {
    %c0_i32 = arith.constant 0 : i32
    %c0_i32_0 = arith.constant 0 : i32
    %c0_i32_1 = arith.constant 0 : i32
    return %c0_i32, %c0_i32_0 : i32, i32
  }
  func.func @transform_2(%arg0: i32) -> (i32, i32) {
    %c0_i32 = arith.constant 0 : i32
    %c0_i32_0 = arith.constant 0 : i32
    %c0_i32_1 = arith.constant 0 : i32
    return %c0_i32, %c0_i32_0 : i32, i32
  }
  func.func @transform_3(%arg0: i32) -> (i32, i32) {
    %c0_i32 = arith.constant 0 : i32
    %c0_i32_0 = arith.constant 0 : i32
    %c0_i32_1 = arith.constant 0 : i32
    return %c0_i32, %c0_i32_0 : i32, i32
  }
  func.func @transform_4(%arg0: i32) -> (i32, i32) {
    %c0_i32 = arith.constant 0 : i32
    %c0_i32_0 = arith.constant 0 : i32
    %c0_i32_1 = arith.constant 0 : i32
    return %c0_i32, %c0_i32_0 : i32, i32
  }
  func.func @transform_5(%arg0: i32) -> (i32, i32) {
    %c0_i32 = arith.constant 0 : i32
    %c0_i32_0 = arith.constant 0 : i32
    return %arg0, %c0_i32 : i32, i32
  }
  func.func @transform_6(%arg0: i32) -> (i32, i32) {
    %c0_i32 = arith.constant 0 : i32
    %c0_i32_0 = arith.constant 0 : i32
    return %arg0, %c0_i32 : i32, i32
  }
}

</mosaic_0001>

<bundles_post_ra>
// kernel: tpu_custom_call.1
= control target key start
LH: loop header
LB: loop body
LE: loop exit
PB: predicated region body
PF: predicated region fallthrough
CT: control target
= control target key end

     0   :  { %12 = vsyncpa [#allocation3], 0  ;;  %s403_s0 = inlined_call_operand.hbm [shape: bf16[16,16], index: 0, kind: input, shape index: {}]   ;;  %s404_s1 = inlined_call_operand.hbm [shape: bf16[16,64], index: 1, kind: input, shape index: {}]   ;;  %s405_s2 = inlined_call_operand.vmem [shape: f32[1,64], index: 2, kind: input, shape index: {}]   ;;  %s406_s3 = inlined_call_operand.hbm [shape: bf16[16,64], index: 3, kind: input, shape index: {}]   ;;  %s407_s4 = inlined_call_operand.vmem [shape: f32[1,64], index: 4, kind: input, shape index: {}]   ;;  %s408_s5 = inlined_call_operand.hbm [shape: f32[16,64], index: 5, kind: output, shape index: {0}]   ;;  %s409_s6 = inlined_call_operand.hbm [shape: f32[16,64], index: 6, kind: output, shape index: {1}]  }
   0x1   :  { %13 = vsyncpa [#allocation6], 0 }
   0x2   :  { %14 = vsyncpa [#allocation4], 0 }
   0x3   :  { %15 = vsyncpa [#allocation10], 0  ;;  %s33_s23 = sshll.u32 %s404_s1, 4  ;;  %s334_s24 = smov [#allocation5]   ;;  %s34_s23 = int_to_ptr.hbm [resolvable:$true] %s33_s23 }
   0x4   :  { %s35_s25 = sshll.u32 %s334_s24, 4  ;;  %s20_s28 = sshll.u32 %s403_s0, 4  ;;  %s36_s25 = int_to_ptr.vmem [resolvable:$true] %s35_s25  ;;  %s21_s28 = int_to_ptr.hbm [resolvable:$true] %s20_s28 }
   0x5   :  { %s335_s29 = smov 64   ;;  %s336_s30 = smov 4  }
   0x6   :  { %41 = dma.hbm_to_vmem [thread:$0]  %s34_s23, 128, %s36_s25, [#allocation6], %s335_s29, %s335_s29, %s336_s30  }
   0x7   :  { %s337_s7 = smov [#allocation2]   ;;  %s48_s11 = sshll.u32 %s406_s3, 4  ;;  %s49_s11 = int_to_ptr.hbm [resolvable:$true] %s48_s11 }
   0x8   :  { %s22_s8 = sshll.u32 %s337_s7, 4  ;;  %s338_s1 = smov [#allocation7]   ;;  %s23_s8 = int_to_ptr.vmem [resolvable:$true] %s22_s8 }
   0x9   :  { %28 = dma.hbm_to_vmem [thread:$0]  %s21_s28, 128, %s23_s8, [#allocation3], %s335_s29, %s335_s29, %s336_s30  }
   0xa   :  { %s50_s12 = sshll.u32 %s338_s1, 4  ;;  %s51_s12 = int_to_ptr.vmem [resolvable:$true] %s50_s12 }
   0xb   :  { %56 = dma.hbm_to_vmem [thread:$0]  %s49_s11, 128, %s51_s12, [#allocation6], %s335_s29, %s335_s29, %s336_s30  }
   0xc   :  { %326 = dma.done.wait [#allocation3], 128  }
   0xd   :  { %327 = vsyncadd [#allocation3], 4294967168 }
   0xe   :  { %328 = dma.done.wait [#allocation6], 256  }
   0xf   :  { %329 = vsyncadd [#allocation6], 4294967040  ;;  %v193_v0 = vld [vmem:[#allocation5] sm:$0xff]  ;;  %v194_v1 = vld [vmem:[#allocation7] sm:$0xff]  ;;  %vm91_vm0 = vcmask 130048   ;;  %vm109_vm1 = vcmask 523264  }
  0x10   :  { %v192_v2 = vld [vmem:[#allocation2] sm:$0xff]  ;;  %102 = vmatpush.bf16.msra.mxu0 %v193_v0  ;;  %131 = vmatpush.bf16.msra.mxu1 %v194_v1  ;;  %s339_s15 = smov [#allocation8]   ;;  %s146_s19 = sshll.u32 %s408_s5, 4  ;;  %s147_s19 = int_to_ptr.hbm [resolvable:$true] %s146_s19 }
  0x11   :  { %v204_v3 = vld [vmem:[%s405_s2] ss:$0 sm:$0xff]  ;;  %s144_s16 = sshll.u32 %s339_s15, 4  ;;  %s340_s2 = smov [#allocation9]   ;;  %s145_s16 = int_to_ptr.vmem [resolvable:$true] %s144_s16 }
  0x12   :  { %v205_v4 = vld [vmem:[%s407_s4] ss:$0 sm:$0xff]  ;;  %s157_s20 = sshll.u32 %s340_s2, 4  ;;  %s159_s4 = sshll.u32 %s409_s6, 4  ;;  %s158_s20 = int_to_ptr.vmem [resolvable:$true] %s157_s20  ;;  %s160_s4 = int_to_ptr.hbm [resolvable:$true] %s159_s4 }
  0x13   :  { %186 = vmatmul.msk.bf16.vlgmr.msra.gmra.mxu0 %vm91_vm0, %v192_v2  ;;  %191 = vmatmul.msk.bf16.vlgmr.msra.gmra.mxu1 %vm91_vm0, %v192_v2  ;;  %s341_s23 = smov 128   ;;  %s342_s5 = smov 8  }
  0x90   :  { %v104_v5 = vpop.f32.mrf.mxu0  ;;  %v133_v6 = vpop.f32.mrf.mxu1 }
  0x91   :  { %v105_v7 = vadd.f32 %v204_v3, %v104_v5  ;;  %v134_v8 = vadd.f32 %v205_v4, %v133_v6 }
  0x93   :  { %110 = vst.msk [vmem:[#allocation8] sm:$0xff] %vm109_vm1, %v105_v7 }
  0x94   :  { %138 = vst.msk [vmem:[#allocation9] sm:$0xff] %vm109_vm1, %v134_v8 }
  0x98   :  { %v106_v9 = vpop.f32.mrf.mxu0  ;;  %v135_v10 = vpop.f32.mrf.mxu1 }
  0x99   :  { %v107_v11 = vadd.f32 %v204_v3, %v106_v9  ;;  %v136_v12 = vadd.f32 %v205_v4, %v135_v10 }
  0x9b   :  { %111 = vst.msk [vmem:[#allocation8 + $0x8] sm:$0xff] %vm109_vm1, %v107_v11 }
  0x9c   :  { %139 = vst.msk [vmem:[#allocation9 + $0x8] sm:$0xff] %vm109_vm1, %v136_v12  ;;  %152 = dma.vmem_to_hbm [thread:$0]  %s145_s16, 256, %s147_s19, [#allocation4], %s341_s23, %s341_s23, %s342_s5  }
  0x9d   :  { %165 = dma.vmem_to_hbm [thread:$0]  %s158_s20, 256, %s160_s4, [#allocation10], %s341_s23, %s341_s23, %s342_s5  }
  0x9e   :  { %330 = dma.done.wait [#allocation4], 256  }
  0x9f   :  { %331 = vsyncadd [#allocation4], 4294967040 }
  0xa0   :  { %332 = dma.done.wait [#allocation10], 256  }
  0xa1   :  { %333 = vsyncadd [#allocation10], 4294967040 }
  0xa2   :  { %174 = vsyncpa [#allocation3], 1 }
  0xa3   :  { %175 = vsyncpa [#allocation6], 1 }
  0xa4   :  { %176 = vsyncpa [#allocation4], 1 }
  0xa5   :  { %177 = vsyncpa [#allocation10], 1 }

</bundles_post_ra>
